<compile_context>
chip_gen: v6e
topology: v6e:2x2x1
jax: 0.10.0
libtpu: 0.0.40
codegen_flags: <defaults>
</compile_context>

<pallas_src>
import functools

import jax
import jax.numpy as jnp
import numpy as np
from jax.experimental import pallas as pl
from jax.experimental.pallas import tpu as pltpu


# ------------------------------------ tiling helpers ------------------------------------

def _round_up(x, m):
    return (x + m - 1) // m * m


def _choose_row_tiling(rows, max_rt=256):
    # Prefer a multiple-of-8 divisor of `rows` that still yields >= 2 grid steps
    # (keeps both v7x TensorCores busy via the "parallel" axis), capped at 256
    # (MXU-native M on v6e/v7x; also fine on v5e). If no friendly divisor exists,
    # pad the rows (zero rows pool to zero and are sliced off outside).
    for t in (256, 128, 64, 32, 16, 8):
        if t <= max_rt and rows % t == 0 and rows // t >= 2:
            return t, rows
    for t in (256, 128, 64, 32, 16, 8):
        if t <= max_rt and rows % t == 0:
            return t, rows
    rt = min(max_rt, _round_up(rows, 8))
    return rt, _round_up(rows, rt)


def _choose_k_tiling(K, max_tile=4096):
    # K tile: a lane-aligned (multiple of 128) divisor of K, all of K, or -- as a
    # last resort for awkward K -- a padded K (pad columns/rows are zero, so the
    # matmul result is unchanged).
    if K <= max_tile:
        return K, K
    t = (max_tile // 128) * 128
    while t >= 128:
        if K % t == 0:
            return t, K
        t -= 128
    kt = (max_tile // 128) * 128
    return kt, _round_up(K, kt)


@functools.lru_cache(maxsize=None)
def _pool_matrix_np(H, W, ds, n_pad, k_pad):
    # (k_pad, n_pad) 0/1 window-membership matrix (the 1/ds^2 scale is applied
    # in-kernel in f32 so the low-precision operand stays exact for any ds).
    # Padded rows/columns are zero, so pad lanes of the pooled output are exact
    # zeros (downstream sums over Npad are therefore exact).
    h, w = H // ds, W // ds
    m = np.zeros((k_pad, n_pad), dtype=np.float32)
    rows = np.arange(H * W)
    p, q = rows // W, rows % W
    m[rows, (p // ds) * w + (q // ds)] = 1.0
    return m


# ----------------------------- Kernel 1: AvgPool2d as matmul -----------------------------

def _avg_pool_kernel(x_ref, m_ref, pooled_ref, *, inv_area, kt, compute_dtype):
    k = pl.program_id(1)

    @pl.when(k == 0)
    def _():
        pooled_ref[...] = jnp.zeros_like(pooled_ref)

    # k-window of the VMEM-resident pooling matrix (fetched from HBM only once).
    start = k * kt
    if kt % 128 == 0:
        start = pl.multiple_of(start, 128)
    m_blk = m_ref[pl.ds(start, kt), :]

    # In-kernel cast of the mask tile (VPU work hidden under the input DMA; exact
    # for 0/1 DetCon masks; accumulation stays f32 in the resident output block).
    x_blk = x_ref[...].astype(compute_dtype)
    pooled_ref[...] += jnp.dot(x_blk, m_blk, preferred_element_type=jnp.float32)

    @pl.when(k == pl.num_programs(1) - 1)
    def _():
        pooled_ref[...] *= inv_area


_M_RESIDENT_BUDGET = 28 * 1024 * 1024  # budget for the (double-buffered) resident pooling matrix


def avg_pool(masks, downsample, *, binary_masks=True, max_k_tile=4096):
    """AvgPool2d(ds, ds) over (B, C, H, W) -> (B, C, Npad) f32, pad lanes exactly 0."""
    B, C, H, W = masks.shape
    assert H % downsample == 0 and W % downsample == 0
    h, w = H // downsample, W // downsample
    hw = h * w
    n_pad = _round_up(hw, 128)          # lane-dense output slab
    rows, K = B * C, H * W

    # bf16 MXU operands are exact only because DetCon masks are strictly 0/1;
    # soft / float-valued masks must keep the f32 path (gate via binary_masks).
    compute_dtype = jnp.bfloat16 if binary_masks else jnp.float32
    m_itemsize = jnp.dtype(compute_dtype).itemsize

    rt, rows_pad = _choose_row_tiling(rows)
    kt, K_pad = _choose_k_tiling(K, max_k_tile)

    m_resident = 2 * K_pad * n_pad * m_itemsize   # double-buffer slot is allocated even though it is fetched once
    if m_resident > _M_RESIDENT_BUDGET:
        # Small-downsample / large pooled-spatial regime: a dense (H*W, Npad)
        # pooling matrix is Npad-fold redundant MXU work and cannot stay
        # VMEM-resident (breaks first on v7x's 64 MiB).
        # TODO(synk): two-stage factored pooling kernel ((ds*W, w) applied per
        # pooled row); for now fall back to the bandwidth-optimal XLA reshape+mean.
        pooled = masks.astype(jnp.float32).reshape(
            B, C, h, downsample, w, downsample).mean(axis=(3, 5)).reshape(B, C, hw)
        if n_pad != hw:
            pooled = jnp.pad(pooled, ((0, 0), (0, 0), (0, n_pad - hw)))
        return pooled

    m = jnp.asarray(_pool_matrix_np(H, W, downsample, n_pad, K_pad),
                    dtype=compute_dtype)
    # Native dtype: NO wrapper-side cast/copy of the dominant tensor (cast happens
    # per-tile inside the kernel). reshape is a free metadata op.
    x = masks.reshape(rows, K)
    if rows_pad != rows or K_pad != K:   # rare fallback for awkward shapes
        x = jnp.pad(x, ((0, rows_pad - rows), (0, K_pad - K)))

    x_itemsize = jnp.dtype(x.dtype).itemsize
    vmem_needed = (2 * rt * kt * x_itemsize      # x double buffer
                   + m_resident                  # resident pooling matrix
                   + 2 * rt * n_pad * 4)         # f32 output double buffer
    vmem_limit = None
    if vmem_needed > 12 * 1024 * 1024:           # only raise past v5e's 16 MiB default scoped VMEM
        vmem_limit = int(min(vmem_needed + (8 << 20), 60 << 20))  # stay inside v7x's 64 MiB

    pooled = pl.pallas_call(
        functools.partial(_avg_pool_kernel,
                          inv_area=1.0 / float(downsample * downsample),
                          kt=kt, compute_dtype=compute_dtype),
        out_shape=jax.ShapeDtypeStruct((rows_pad, n_pad), jnp.float32),
        grid_spec=pltpu.PrefetchScalarGridSpec(
            num_scalar_prefetch=0,
            grid=(rows_pad // rt, K_pad // kt),
            in_specs=[
                pl.BlockSpec((rt, kt), lambda r, k: (r, k)),
                # Full-array block with a CONSTANT index: DMA'd from HBM exactly
                # once, VMEM-resident for the whole grid (k window sliced in-kernel).
                pl.BlockSpec((K_pad, n_pad), lambda r, k: (0, 0)),
            ],
            out_specs=pl.BlockSpec((rt, n_pad), lambda r, k: (r, 0)),
        ),
        compiler_params=pltpu.CompilerParams(
            dimension_semantics=("parallel", "arbitrary"),
            vmem_limit_bytes=vmem_limit),
    )(x, m)
    return pooled[:rows].reshape(B, C, n_pad)


# --------------------- Kernel 2: gather sampled masks + area-normalize -------------------

def _gather_normalize_kernel(ids_ref, pooled_ref, out_ref, *, num_samples):
    # One grid step per batch: the whole (C, Npad) pooled slab is VMEM-resident.
    # Gather each sampled row with dynamic sublane indexing and store it directly
    # (no jnp.concatenate temp / vreg shuffles). Exact divide for the area norm.
    b = pl.program_id(0)
    for s in range(num_samples):
        row = pooled_ref[0, pl.ds(ids_ref[b, s], 1), :]        # (1, Npad) f32
        area = jnp.sum(row, axis=-1, keepdims=True)            # pad lanes are exactly 0
        out_ref[0, pl.ds(s, 1), :] = row / jnp.maximum(area, 1.0)


def gather_and_normalize(pooled_bcn, mask_ids):
    B, C, n_pad = pooled_bcn.shape
    S = mask_ids.shape[1]
    return pl.pallas_call(
        functools.partial(_gather_normalize_kernel, num_samples=S),
        out_shape=jax.ShapeDtypeStruct((B, S, n_pad), pooled_bcn.dtype),
        grid_spec=pltpu.PrefetchScalarGridSpec(
            num_scalar_prefetch=1,          # mask_ids -> SMEM
            grid=(B,),
            in_specs=[pl.BlockSpec((1, C, n_pad), lambda b, ids: (b, 0, 0))],
            out_specs=pl.BlockSpec((1, S, n_pad), lambda b, ids: (b, 0, 0)),
        ),
        compiler_params=pltpu.CompilerParams(dimension_semantics=("parallel",)),
    )(mask_ids, pooled_bcn)


# -------------------------------- sampling (plain JAX glue) ------------------------------

def sample_mask_ids(key, channel_sums, num_samples):
    # TODO(synk): torch.multinomial (sampling w/o replacement) has no clean Pallas
    # equivalent; implemented with the Gumbel-top-k trick in plain JAX
    # (distributionally equivalent to torch.multinomial, RNG stream differs).
    masks_sum = channel_sums + 1e-11                  # (B, C)
    probs = masks_sum / masks_sum.sum(axis=1, keepdims=True)
    g = jax.random.gumbel(key, probs.shape, dtype=probs.dtype)
    _, ids = jax.lax.top_k(jnp.log(probs) + g, num_samples)
    return ids.astype(jnp.int32)


def mask_pooling_forward(masks, *, num_samples, downsample, key, binary_masks=True):
    B, C, H, W = masks.shape
    h, w = H // downsample, W // downsample
    hw = h * w
    pooled_bcn = avg_pool(masks, downsample, binary_masks=binary_masks)  # (B, C, Npad)
    # Pad lanes are exactly zero, so this XLA reduction over the small pooled slab
    # is exact and cheap (replaces the masked (rt,1) sums output in kernel 1).
    channel_sums = pooled_bcn.sum(axis=-1)                               # (B, C)
    mask_ids = sample_mask_ids(key, channel_sums, num_samples)
    out_pad = gather_and_normalize(pooled_bcn, mask_ids)                 # (B, S, Npad)
    sampled = out_pad[:, :, :hw].reshape(B, num_samples, h, w)
    return sampled, mask_ids


# ------------------------------------------ main -----------------------------------------

if __name__ == "__main__":
    B, C, H, W = 2, 8, 16, 16          # batch, num_classes, spatial
    downsample = 4
    num_samples = 4
    h, w = H // downsample, W // downsample

    key = jax.random.PRNGKey(0)
    k_mask, k_sample = jax.random.split(key)
    # DetCon-style binary masks: one-hot class map per pixel (0/1 -> bf16 exact).
    cls_map = jax.random.randint(k_mask, (B, H, W), 0, C)
    masks = jax.nn.one_hot(cls_map, C, axis=1, dtype=jnp.float32)   # (B, C, H, W)

    sampled_masks, mask_ids = mask_pooling_forward(
        masks, num_samples=num_samples, downsample=downsample, key=k_sample)
    sampled_masks, mask_ids = jax.block_until_ready((sampled_masks, mask_ids))

    # Reference check (same sampled ids, exact f32 path). The kernel path is exact
    # for binary masks (bf16 0/1 operands, f32 accumulation, exact divide).
    ref_pooled = masks.reshape(B, C, h, downsample, w, downsample).mean(axis=(3, 5))
    ref_gather = ref_pooled[jnp.arange(B)[:, None], mask_ids]
    ref_area = ref_gather.sum(axis=(2, 3), keepdims=True)
    ref_out = ref_gather / jnp.maximum(ref_area, 1.0)

    np.testing.assert_allclose(np.asarray(sampled_masks), np.asarray(ref_out),
                               rtol=1e-5, atol=1e-6)
    assert sampled_masks.shape == (B, num_samples, h, w)
    assert mask_ids.shape == (B, num_samples)

    print("KERNEL_OK")
</pallas_src>

<mosaic_0001>
module attributes {stable_mosaic.version = 11 : i64} {
  func.func @_avg_pool_kernel(%arg0: i32, %arg1: i32, %arg2: memref<8x256xf32, #tpu.memory_space<vmem>>, %arg3: memref<256x128xbf16, #tpu.memory_space<vmem>>, %arg4: memref<8x128xf32, #tpu.memory_space<vmem>>) attributes {dimension_semantics = [#tpu.dimension_semantics<parallel>, #tpu.dimension_semantics<arbitrary>], iteration_bounds = array<i64: 2, 1>, scalar_prefetch = 0 : i64, scratch_operands = 0 : i64, tpu.core_type = #tpu.core_type<tc>, window_params = [{transform_indices = @transform_0, window_bounds = array<i64: 8, 256>}, {pipeline_mode = #tpu.pipeline_mode<synchronous>, transform_indices = @transform_1, window_bounds = array<i64: 256, 128>}, {transform_indices = @transform_2, window_bounds = array<i64: 8, 128>}]} {
    %c0_i32 = arith.constant 0 : i32
    %0 = arith.cmpi eq, %arg1, %c0_i32 : i32
    %1 = arith.extui %0 : i1 to i32
    %c0_i32_0 = arith.constant 0 : i32
    %2 = arith.cmpi ne, %1, %c0_i32_0 : i32
    scf.if %2 {
      %cst_9 = arith.constant 0.000000e+00 : f32
      %16 = vector.broadcast %cst_9 : f32 to vector<8x128xf32>
      %c0_10 = arith.constant 0 : index
      %c0_11 = arith.constant 0 : index
      %17 = vector.load %arg4[%c0_10, %c0_11] : memref<8x128xf32, #tpu.memory_space<vmem>>, vector<8x128xf32>
      tpu.vector_store %arg4[%c0_10, %c0_11], %16 {strides = array<i32>} : memref<8x128xf32, #tpu.memory_space<vmem>>, vector<8x128xf32>,
    } else {
    }
    %c256_i32 = arith.constant 256 : i32
    %3 = arith.muli %arg1, %c256_i32 : i32
    %4 = tpu.assume_multiple %3, 128 : i32
    %5 = arith.index_cast %4 : i32 to index
    %c0 = arith.constant 0 : index
    %6 = vector.load %arg3[%5, %c0] : memref<256x128xbf16, #tpu.memory_space<vmem>>, vector<256x128xbf16>
    %c0_1 = arith.constant 0 : index
    %c0_2 = arith.constant 0 : index
    %7 = vector.load %arg2[%c0_1, %c0_2] : memref<8x256xf32, #tpu.memory_space<vmem>>, vector<8x256xf32>
    %8 = arith.truncf %7 : vector<8x256xf32> to vector<8x256xbf16>
    %c0_3 = arith.constant 0 : index
    %c0_4 = arith.constant 0 : index
    %9 = vector.load %arg4[%c0_3, %c0_4] : memref<8x128xf32, #tpu.memory_space<vmem>>, vector<8x128xf32>
    %cst = arith.constant dense<0.000000e+00> : vector<8x128xf32>
    %10 = tpu.matmul %8, %6, %cst {dimension_numbers = #tpu.dot_dimension_numbers<[1], [0], [0], [1], [0, 0, 1, 1], [], []>} : vector<8x256xbf16>, vector<256x128xbf16>, vector<8x128xf32> -> vector<8x128xf32>
    %11 = arith.addf %9, %10 : vector<8x128xf32>
    %c0_5 = arith.constant 0 : index
    %c0_6 = arith.constant 0 : index
    %12 = vector.load %arg4[%c0_5, %c0_6] : memref<8x128xf32, #tpu.memory_space<vmem>>, vector<8x128xf32>
    tpu.vector_store %arg4[%c0_5, %c0_6], %11 {strides = array<i32>} : memref<8x128xf32, #tpu.memory_space<vmem>>, vector<8x128xf32>,
    %c0_i32_7 = arith.constant 0 : i32
    %13 = arith.cmpi eq, %arg1, %c0_i32_7 : i32
    %14 = arith.extui %13 : i1 to i32
    %c0_i32_8 = arith.constant 0 : i32
    %15 = arith.cmpi ne, %14, %c0_i32_8 : i32
    scf.if %15 {
      %c0_9 = arith.constant 0 : index
      %c0_10 = arith.constant 0 : index
      %16 = vector.load %arg4[%c0_9, %c0_10] : memref<8x128xf32, #tpu.memory_space<vmem>>, vector<8x128xf32>
      %cst_11 = arith.constant 6.250000e-02 : f32
      %17 = vector.broadcast %cst_11 : f32 to vector<8x128xf32>
      %18 = arith.mulf %16, %17 : vector<8x128xf32>
      %c0_12 = arith.constant 0 : index
      %c0_13 = arith.constant 0 : index
      %19 = vector.load %arg4[%c0_12, %c0_13] : memref<8x128xf32, #tpu.memory_space<vmem>>, vector<8x128xf32>
      tpu.vector_store %arg4[%c0_12, %c0_13], %18 {strides = array<i32>} : memref<8x128xf32, #tpu.memory_space<vmem>>, vector<8x128xf32>,
    } else {
    }
    return
  }
  func.func @transform_0(%arg0: i32, %arg1: i32) -> (i32, i32) {
    %c0_i32 = arith.constant 0 : i32
    return %arg0, %arg1 : i32, i32
  }
  func.func @transform_1(%arg0: i32, %arg1: i32) -> (i32, i32) {
    %c0_i32 = arith.constant 0 : i32
    %c0_i32_0 = arith.constant 0 : i32
    %c0_i32_1 = arith.constant 0 : i32
    return %c0_i32, %c0_i32_0 : i32, i32
  }
  func.func @transform_2(%arg0: i32, %arg1: i32) -> (i32, i32) {
    %c0_i32 = arith.constant 0 : i32
    %c0_i32_0 = arith.constant 0 : i32
    return %arg0, %c0_i32 : i32, i32
  }
}

</mosaic_0001>

<bundles_post_ra>
// kernel: tpu_custom_call.1
= control target key start
LH: loop header
LB: loop body
LE: loop exit
PB: predicated region body
PF: predicated region fallthrough
CT: control target
= control target key end

     0   :  { %7 = vsyncpa [#allocation3], 0  ;;  %s970_s0 = inlined_call_operand.hbm [shape: f32[16,256], index: 0, kind: input, shape index: {}]   ;;  %s971_s1 = inlined_call_operand.hbm [shape: bf16[256,128], index: 1, kind: input, shape index: {}]   ;;  %s972_s2 = inlined_call_operand.hbm [shape: f32[16,128], index: 2, kind: output, shape index: {}]  }
   0x1   :  { %9 = vsyncpa [#allocation3 + $0x1], 0 }
   0x2   :  { %10 = vsyncpa [#allocation6], 0 }
   0x3   :  { %11 = vsyncpa [#allocation4], 0 }
   0x4   :  { %13 = vsyncpa [#allocation4 + $0x1], 0  ;;  %s798_s9 = smov 0   ;;  %s800_s10 = smov 0  }
   0x5   :  { %s802_s11 = smov 0   ;;  %s804_s12 = smov 0  }
   0x6   :  { %s806_s13 = smov 0   ;;  %s808_s14 = smov 0  }
   0x7 LB: > { %s491_s15 = sadd.s32 4294967295, %s776_s14   ;;  %s492_s16 = sadd.s32 4294967294, %s776_s14   ;;  %s776_s14 = sphi %s808_s14, %s19_s14   ;;  %s772_s13 = sphi %s806_s13, %s990_s13   ;;  %s768_s12 = sphi %s804_s12, %s989_s12   ;;  %s764_s11 = sphi %s802_s11, %s988_s11   ;;  %s760_s10 = sphi %s800_s10, %s987_s10   ;;  %s756_s9 = sphi %s798_s9, %s986_s9  }
   0x8   : > { %p53_p0 = scmp.ne.s32.totalorder %s760_s10, %s756_s9  ;;  %p832_p1 = scmp.eq.s32.totalorder %s491_s15, 0 }
   0x9   : > { %p836_p2 = scmp.eq.s32.totalorder %s491_s15, 1  ;;  %p104_p3 = scmp.eq.s32.totalorder %s492_s16, 1 }
   0xa   : > { %p842_p4 = por %p832_p1, %p53_p0  ;;  %p493_p5 = scmp.ge.s32.totalorder %s776_s14, 1 }
   0xb   : > { %p847_p6 = por %p104_p3, %p53_p0  ;;  %p111_p7 = scmp.lt.s32.totalorder %s776_s14, 3 }
   0xc   : > { %s976_s19 = scalar_select %p842_p4, 1, 0 }
   0xd   : > { %s977_s20 = scalar_select %p847_p6, 1, 0 }
   0xe   : > { %p852_p8 = pnand %p493_p5, %p111_p7  ;;  %s778_s22 = smov [#allocation5]  }
   0xf   : > { %s123_s23 = sshll.u32 %s778_s22, 4  ;;  %s31_s25 = sadd.s32 1, %s772_s13  ;;  %s124_s23 = int_to_ptr.vmem [resolvable:$true] %s123_s23 }
  0x10   : > { %p554_p9 = pneg %p852_p8  ;;  %s649_s26 = scalar_lea.vmem %s124_s23, 2048 }
  0x11   : > { %p650_p13 = scmp.ne.s32.totalorder %s124_s23, %s649_s26  ;;  %p657_p5 = scmp.lt.s32.totalorder %s124_s23, %s124_s23 }
  0x12   : > { %p861_p11 = pnand %p554_p9, %p832_p1  ;;  %p658_p7 = scmp.lt.s32.totalorder %s649_s26, %s649_s26 }
  0x14   : > { %p640_p12 = pneg %p861_p11  ;;  %p659_p6 = por %p658_p7, %p657_p5 }
  0x16   : > { %p652_p0 = pnand %p650_p13, %p640_p12 }
  0x18   : > { %p653_p3 = pneg %p652_p0 }
  0x1a   : > { %p660_p4 = pnand %p659_p6, %p653_p3 }
  0x1c   : > { %663 = shalt.err (!%p660_p4)
}
  0x1d   : > { %s779_s27 = smov 64   ;;  %s780_s28 = smov 4  }
  0x1e   : > { %557 = dma.hbm_to_vmem [thread:$0]  (!%p861_p11), %s971_s1, 2048, %s124_s23, [#allocation6], %s779_s27, %s779_s27, %s780_s28  }
  0x1f   : > { %p33_p6 = scmp.ge.s32.totalorder %s31_s25, 2  ;;  %s40_s3 = sadd.s32 1, %s764_s11 }
  0x20   : > { %p47_p4 = scmp.ne.s32.totalorder %s764_s11, %s760_s10  ;;  %p48_p9 = scmp.eq.s32.totalorder %s776_s14, 0 }
  0x21   : > { %s992_s25 = smov (%p33_p6, %s31_s25), 0  ;;  %p567_p0 = scmp.lt.s32.totalorder %s776_s14, 2 }
  0x22   : > { %p879_p12 = por %p48_p9, %p47_p4  ;;  %p885_p13 = por %p836_p2, %p47_p4 }
  0x23   : > { %s35_s6 = ssub.s32 %s772_s13, %s992_s25  ;;  %s137_s7 = sand.u32 1, %s764_s11  }
  0x24   : > { %p38_p11 = scmp.eq.s32.totalorder %s35_s6, 0  ;;  %s496_s8 = sshll.u32 %s137_s7, 4 }
  0x25   : > { %s523_s16 = sshll.u32 %s772_s13, 8  ;;  %s141_s26 = scalar_lea.vmem [#allocation2], %s496_s8 }
  0x26   : > { %s894_s15 = scalar_select %p38_p11, %s764_s11, %s40_s3  }
  0x27   : > { %s149_s24 = scalar_lea.hbm %s970_s0, %s523_s16  ;;  %s151_s27 = sshll.u32 %s141_s26, 4  ;;  %s152_s27 = int_to_ptr.vmem [resolvable:$true] %s151_s27 }
  0x28   : > { %p902_p2 = pnand %p567_p0, %p879_p12  ;;  %s138_s28 = scalar_lea.sflag [#allocation3], %s137_s7 }
  0x29   : > { %s677_s29 = scalar_lea.vmem %s152_s27, 256  ;;  %s781_s30 = smov [#allocation2]  }
  0x2a   : > { %p666_p3 = pneg %p902_p2  ;;  %p678_p5 = scmp.ne.s32.totalorder %s152_s27, %s677_s29 }
  0x2b   : > { %s682_s3 = sshll.u32 %s781_s30, 4  ;;  %s683_s3 = int_to_ptr.vmem [resolvable:$false] %s682_s3 }
  0x2c   : > { %p680_p7 = pnand %p678_p5, %p666_p3  ;;  %s684_s6 = scalar_lea.vmem %s683_s3, 512 }
  0x2d   : > { %p685_p4 = scmp.lt.s32.totalorder %s152_s27, %s683_s3  ;;  %p686_p9 = scmp.lt.s32.totalorder %s684_s6, %s677_s29 }
  0x2e   : > { %p681_p6 = pneg %p680_p7 }
  0x2f   : > { %p687_p11 = por %p686_p9, %p685_p4 }
  0x31   : > { %p688_p10 = pnand %p687_p11, %p681_p6 }
  0x33   : > { %691 = shalt.err (!%p688_p10)
}
  0x34   : > { %561 = dma.hbm_to_vmem [thread:$0]  (!%p902_p2), %s149_s24, 256, %s152_s27, %s138_s28  }
  0x35   : > { %160 = sbr.rel (%p852_p8) target bundleno = 306 (0x132), region = 28  ;;  %s913_s4 = sand.u32 (!%p852_p8), 1, %s760_s10  }
  0x36   : > { %s500_s7 = sshll.u32 (!%p852_p8), %s913_s4, 4  ;;  %s163_s8 = scalar_lea.sflag (!%p852_p8), [#allocation3], %s913_s4 }
  0x37   : > { %s917_s16 = scalar_lea.vmem (!%p852_p8), [#allocation2], %s500_s7  ;;  %p983_p12 = scmp.ne.s32.totalorder (!%p852_p8), %s976_s19, 0 }
  0x3a   : > { %743 = dma.done.wait (%p983_p12), %s163_s8, 256  }
  0x3b   : > { %745 = vsyncadd (%p983_p12), %s163_s8, 4294967040 }
  0x3c   : > { %747 = dma.done.wait (%p832_p1), [#allocation6], 2048  }
  0x3d   : > { %749 = vsyncadd (%p832_p1), [#allocation6], 4294965248  ;;  %v622_v0 = vld [vmem:[#allocation5 + $0x78] sm:$0xff]   ;;  %v624_v2 = vld [vmem:[#allocation5 + $0x70] sm:$0xff]   ;;  %s502_s17 = sshll.u32 %s913_s4, 3  ;;  %s520_s19 = sshll.u32 %s768_s12, 7 }
  0x3e   : > { %v623_v1 = vld [vmem:[#allocation5 + $0x38] sm:$0xff]   ;;  %524 = vmatprep.subr.bf16.mxu0 %v622_v0  ;;  %v625_v3 = vld [vmem:[#allocation5 + $0x30] sm:$0xff]   ;;  %v626_v4 = vld [vmem:[#allocation5 + $0x68] sm:$0xff]   ;;  %s190_s21 = scalar_lea.vmem [#allocation7], %s502_s17  ;;  %s396_s26 = scalar_lea.hbm %s972_s2, %s520_s19 }
  0x3f   : > { %525 = vmatpush3.bf16.msra.mxu0 %v623_v1  ;;  %v627_v5 = vld [vmem:[#allocation5 + $0x28] sm:$0xff]   ;;  %v628_v6 = vld [vmem:[#allocation5 + $0x60] sm:$0xff]   ;;  %v630_v8 = vld [vmem:[#allocation5 + $0x58] sm:$0xff]   ;;  %s398_s22 = sshll.u32 %s190_s21, 4  ;;  %s385_s27 = scalar_lea.sflag [#allocation4], %s913_s4  ;;  %s399_s22 = int_to_ptr.vmem [resolvable:$true] %s398_s22 }
  0x40   : > { %526 = vmatprep.subr.bf16.mxu0 %v624_v2  ;;  %v629_v7 = vld [vmem:[#allocation5 + $0x20] sm:$0xff]   ;;  %v631_v9 = vld [vmem:[#allocation5 + $0x18] sm:$0xff]   ;;  %v632_v10 = vld [vmem:[#allocation5 + $0x50] sm:$0xff]   ;;  %s692_s18 = scalar_lea.vmem %s399_s22, 128  ;;  %s782_s28 = smov [#allocation7]  }
  0x41   : > { %v236_v11 = vld [vmem:[%s917_s16 + $0x8] sm:$0xff]  ;;  %v633_v13 = vld [vmem:[#allocation5 + $0x10] sm:$0xff]   ;;  %v636_v16 = vld [vmem:[#allocation5 + $0x40] sm:$0xff]   ;;  %p693_p1 = scmp.ne.s32.totalorder %s399_s22, %s692_s18  ;;  %s696_s29 = sshll.u32 %s782_s28, 4  ;;  %s697_s29 = int_to_ptr.vmem [resolvable:$false] %s696_s29 }
  0x42   : > { %v238_v12 = vpack.c.bf16 %v236_v11, %v236_v11  ;;  %v634_v14 = vld [vmem:[#allocation5 + $0x48] sm:$0xff]   ;;  %v637_v17 = vld [vmem:[#allocation5] sm:$0xff]   ;;  %s698_s12 = scalar_lea.vmem %s697_s29, 256  ;;  %p699_p0 = scmp.lt.s32.totalorder %s399_s22, %s697_s29 }
  0x43   : > { %527 = vmatpush3.bf16.msra.mxu0 %v625_v3  ;;  %v635_v15 = vld [vmem:[#allocation5 + $0x8] sm:$0xff]   ;;  %v235_v18 = vld [vmem:[%s917_s16] sm:$0xff]  ;;  %p694_p8 = pnand %p693_p1, %p885_p13  ;;  %p700_p2 = scmp.lt.s32.totalorder %s698_s12, %s692_s18 }
  0x44   : > { %528 = vmatprep.subr.bf16.mxu0 %v626_v4  ;;  %368 = vmatprep.mubr.bf16.mxu0 %v238_v12  ;;  %v237_v19 = vpack.c.bf16 %v235_v18, %v235_v18 }
  0x45   : > { %p695_p10 = pneg %p694_p8  ;;  %p701_p3 = por %p700_p2, %p699_p0 }
  0x47   : > { %529 = vmatpush3.bf16.msra.mxu0 %v627_v5  ;;  %p702_p5 = pnand %p701_p3, %p695_p10 }
  0x48   : > { %530 = vmatprep.subr.bf16.mxu0 %v628_v6 }
  0x4b   : > { %531 = vmatpush3.bf16.msra.mxu0 %v629_v7 }
  0x4c   : > { %532 = vmatprep.subr.bf16.mxu0 %v630_v8 }
  0x4f   : > { %533 = vmatpush3.bf16.msra.mxu0 %v631_v9 }
  0x50   : > { %534 = vmatprep.subr.bf16.mxu0 %v632_v10 }
  0x53   : > { %535 = vmatpush3.bf16.msra.mxu0 %v633_v13 }
  0x54   : > { %536 = vmatprep.subr.bf16.mxu0 %v634_v14 }
  0x57   : > { %537 = vmatpush3.bf16.msra.mxu0 %v635_v15 }
  0x58   : > { %538 = vmatprep.subr.bf16.mxu0 %v636_v16 }
  0x5b   : > { %539 = vmatpush3.bf16.msra.mxu0 %v637_v17 }
  0x5e   : > { %369 = vmatmul.mubr.bf16.vlgmr.msra.gmra.mxu0 %v237_v19 }
 0x11e   : > { %v540_v20 = vpop.f32.mrf.mxu0 }
 0x120   : > { %v541_v21 = vpop.f32.mrf.mxu0 }
 0x121   : > { %v542_v22 = vadd.f32 %v541_v21, %v540_v20 }
 0x122   : > { %v543_v23 = vpop.f32.mrf.mxu0 }
 0x123   : > { %v382_v25 = vmul.f32 0.0625, %v542_v22 }
 0x124   : > { %v544_v24 = vpop.f32.mrf.mxu0 }
 0x125   : > { %383 = vst [vmem:[%s190_s21] sm:$0xff] %v382_v25 }
 0x126   : > { %705 = shalt.err (!%p702_p5)
}
 0x127   : > { %s706_s30 = scalar_lea.hbm %s396_s26, 128  ;;  %s710_s4 = scalar_lea.hbm %s972_s2, 256 }
 0x128   : > { %p707_p7 = scmp.ne.s32.totalorder %s396_s26, %s706_s30  ;;  %p711_p9 = scmp.lt.s32.totalorder %s396_s26, %s972_s2 }
 0x129   : > { %p712_p11 = scmp.lt.s32.totalorder %s710_s4, %s706_s30 }
 0x12a   : > { %p708_p6 = pnand %p707_p7, %p885_p13 }
 0x12b   : > { %p713_p12 = por %p712_p11, %p711_p9 }
 0x12c   : > { %p709_p4 = pneg %p708_p6 }
 0x12e   : > { %p714_p1 = pnand %p713_p12, %p709_p4 }
 0x130   : > { %717 = shalt.err (!%p714_p1)
}
 0x131   : > { %552 = dma.vmem_to_hbm [thread:$0]  (%p885_p13), %s399_s22, 128, %s396_s26, %s385_s27  }
 0x132 PF: > { %s410_s16 = sand.u32 1, %s756_s9   ;;  %p984_p8 = scmp.ne.s32.totalorder %s977_s20, 0 }
 0x133   : > { %p985_p10 = scmp.ge.s32.totalorder %s776_s14, 2  ;;  %s411_s17 = scalar_lea.sflag [#allocation4], %s410_s16 }
 0x135   : > { %p563_p0 = pnand %p985_p10, %p984_p8 }
 0x137   : > { %p564_p2 = pneg %p563_p0 }
 0x139   : > { %751 = dma.done.wait (%p564_p2), %s411_s17, 128  }
 0x13a   : > { %753 = vsyncadd (%p564_p2), %s411_s17, 4294967168  ;;  %s19_s14 = sadd.s32 1, %s776_s14   ;;  %s986_s9 = smov %s760_s10 }
 0x13b   : > { %p16_p3 = scmp.ge.s32.totalorder %s19_s14, 4   ;;  %s987_s10 = smov %s764_s11 }
 0x13c   : > { %s988_s11 = smov %s894_s15  ;;  %s989_s12 = smov %s772_s13 }
 0x13d   : > { %s990_s13 = smov %s992_s25  ;;  %18 = sbr.rel (!%p16_p3) target bundleno = 7 (0x7), region = 86 }
 0x142   :  { %416 = vsyncpa [#allocation3], 1 }
 0x143   :  { %418 = vsyncpa [#allocation3 + $0x1], 1 }
 0x144   :  { %419 = vsyncpa [#allocation6], 1 }
 0x145   :  { %420 = vsyncpa [#allocation4], 1 }
 0x146   :  { %422 = vsyncpa [#allocation4 + $0x1], 1 }

</bundles_post_ra>
